<compile_context>
chip_gen: v5e
topology: v5e:2x2
jax: 0.10.0
libtpu: 0.0.40
codegen_flags: <defaults>
</compile_context>

<pallas_src>
import functools
import math

import jax
import jax.numpy as jnp
from jax.experimental import pallas as pl
from jax.experimental.pallas import tpu as pltpu


def _round_up(v: int, m: int) -> int:
    return ((v + m - 1) // m) * m


def _maestro_linear_kernel(x_ref, w_in_ref, w_out_ref, b_ref, o_ref, inter_ref, *, nk):
    # Grid: (i, s) with s in [0, nk + nj).
    #   s <  nk : accumulate x @ W_in.T (K slice s) into inter_ref (f32 scratch)
    #   s >= nk : emit output N-tile j = s - nk:  inter @ W_out.T + bias
    #
    # x_ref:     (tm, tk)     block of x        (row tile i, K slice min(s, nk-1))
    # w_in_ref:  (tk, I_pad)  block of W_in.T
    # w_out_ref: (I_pad, tn)  block of W_out.T  (N slice max(s-nk, 0))
    # b_ref:     (1, tn)      bias slice
    # o_ref:     (tm, tn)     output block (i, max(s-nk, 0))
    # inter_ref: (tm, I_pad)  f32 scratch, persists across grid steps
    s = pl.program_id(1)

    @pl.when(s == 0)
    def _():
        inter_ref[...] = jnp.zeros_like(inter_ref)

    @pl.when(s < nk)
    def _():
        inter_ref[...] += jnp.dot(
            x_ref[...], w_in_ref[...], preferred_element_type=jnp.float32
        )

    @pl.when(s >= nk)
    def _():
        out = jnp.dot(
            inter_ref[...].astype(w_out_ref.dtype),
            w_out_ref[...],
            preferred_element_type=jnp.float32,
        )
        o_ref[...] = (out + b_ref[...].astype(jnp.float32)).astype(o_ref.dtype)


def _vmem_need_bytes(tm, tk, tn, i_pad, x_isz, w_isz):
    # Double-buffered blocks + the resident f32 intermediate scratch.
    return (
        2 * tm * tk * x_isz          # x block
        + 2 * tk * i_pad * w_isz     # W_in.T block
        + 2 * i_pad * tn * w_isz     # W_out.T block
        + 2 * tn * x_isz             # bias block
        + 2 * tm * tn * x_isz        # output block
        + tm * i_pad * 4             # f32 intermediate scratch
    )


def maestro_linear(x, w_in, w_out, bias, *, tm=None, tk=512, tn=512):
    """Fused MaestroLinear forward: x[..., in_features] -> [..., out_features]."""
    in_features = x.shape[-1]
    inner_dim, in_f = w_in.shape
    out_features, inner_d = w_out.shape
    assert in_f == in_features and inner_d == inner_dim

    lead_shape = x.shape[:-1]
    M = int(math.prod(lead_shape)) if lead_shape else 1

    if bias is None:
        bias = jnp.zeros((out_features,), dtype=x.dtype)

    if inner_dim == 0:
        # Fully pruned layer: forward degenerates to a pure bias broadcast.
        return jnp.broadcast_to(
            bias.astype(x.dtype), (*lead_shape, out_features)
        )

    # --- tiling / padding ----------------------------------------------------
    sub = 16 if x.dtype == jnp.bfloat16 else 8        # sublane granularity
    if tm is None:
        tm = min(512, _round_up(M, sub))
    tm = max(sub, _round_up(tm, sub))

    K_pad = _round_up(in_features, 128)
    I_pad = _round_up(inner_dim, 128)
    N_pad = _round_up(out_features, 128)

    tk = _round_up(min(tk, K_pad), 128)
    tn = _round_up(min(tn, N_pad), 128)

    x_isz = jnp.dtype(x.dtype).itemsize
    w_isz = jnp.dtype(w_in.dtype).itemsize

    # Auto-shrink tiles to a VMEM budget that is safe on v5e/v6e (128 MiB) and
    # v7x (64 MiB).  Shrink the reduction tile first (does not hurt MXU
    # efficiency), then the N tile, then the row tile.
    budget = 48 << 20
    while _vmem_need_bytes(tm, tk, tn, I_pad, x_isz, w_isz) > budget:
        if tk > 128:
            tk = max(128, tk // 2)
        elif tn > 128:
            tn = max(128, tn // 2)
        elif tm > sub:
            tm = max(sub, _round_up(tm // 2, sub))
        else:
            break
    # TODO(synk): extremely large inner_dim (f32 inner dim >> 32k) would also
    # need the inner dimension tiled; not needed at these model sizes.

    K_pad = _round_up(K_pad, tk)
    N_pad = _round_up(N_pad, tn)
    M_pad = _round_up(M, tm)

    x2d = jnp.pad(
        x.reshape(M, in_features),
        ((0, M_pad - M), (0, K_pad - in_features)),
    )
    # Pre-transpose weights once in XLA so the kernel never transposes.
    w_in_t = jnp.pad(w_in.T, ((0, K_pad - in_features), (0, I_pad - inner_dim)))
    w_out_t = jnp.pad(w_out.T, ((0, I_pad - inner_dim), (0, N_pad - out_features)))
    b2d = jnp.pad(bias.reshape(1, out_features), ((0, 0), (0, N_pad - out_features)))

    nm = M_pad // tm
    nk = K_pad // tk
    nj = N_pad // tn
    grid = (nm, nk + nj)

    need = _vmem_need_bytes(tm, tk, tn, I_pad, x_isz, w_isz)
    vmem_limit = int(min(max(need + (2 << 20), 16 << 20), 60 << 20))

    flops = 2 * M_pad * K_pad * I_pad + 2 * M_pad * I_pad * N_pad
    bytes_accessed = (
        x2d.size * x_isz
        + nm * (w_in_t.size + w_out_t.size) * w_isz
        + nm * b2d.size * b2d.dtype.itemsize
        + M_pad * N_pad * x_isz
    )

    kernel = functools.partial(_maestro_linear_kernel, nk=nk)

    # Index maps: clamp so that operands unused in the current phase keep the
    # same block index (no redundant DMA).
    x_map = lambda i, s: (i, jnp.minimum(s, nk - 1))
    w_in_map = lambda i, s: (jnp.minimum(s, nk - 1), 0)
    w_out_map = lambda i, s: (0, jnp.maximum(s - nk, 0))
    b_map = lambda i, s: (0, jnp.maximum(s - nk, 0))
    o_map = lambda i, s: (i, jnp.maximum(s - nk, 0))

    out2d = pl.pallas_call(
        kernel,
        out_shape=jax.ShapeDtypeStruct((M_pad, N_pad), x.dtype),
        grid_spec=pltpu.PrefetchScalarGridSpec(
            num_scalar_prefetch=0,
            grid=grid,
            in_specs=[
                pl.BlockSpec((tm, tk), x_map),        # x
                pl.BlockSpec((tk, I_pad), w_in_map),  # W_in.T
                pl.BlockSpec((I_pad, tn), w_out_map), # W_out.T
                pl.BlockSpec((1, tn), b_map),         # bias
            ],
            out_specs=pl.BlockSpec((tm, tn), o_map),
            scratch_shapes=[pltpu.VMEM((tm, I_pad), jnp.float32)],
        ),
        compiler_params=pltpu.CompilerParams(
            # Row blocks are independent -> "parallel" (megacore sharding).
            # The flattened K/N phase axis carries the intermediate scratch and
            # must stay "arbitrary" (sequential).
            dimension_semantics=("parallel", "arbitrary"),
            vmem_limit_bytes=vmem_limit,
        ),
        cost_estimate=pl.CostEstimate(
            flops=flops, transcendentals=0, bytes_accessed=bytes_accessed
        ),
    )(x2d, w_in_t, w_out_t, b2d)

    out2d = out2d[:M, :out_features]
    return out2d.reshape(*lead_shape, out_features)


def init_maestro_linear_params(key, in_features, out_features):
    """Deterministic init mirroring nn.Linear.reset_parameters shapes/bounds."""
    inner_dim = min(in_features, out_features)
    k_in, k_out, k_b = jax.random.split(key, 3)
    # kaiming_uniform_(a=sqrt(5)) on Linear weight == U(-1/sqrt(fan_in), 1/sqrt(fan_in))
    bound_in = 1.0 / math.sqrt(in_features)
    w_in = jax.random.uniform(
        k_in, (inner_dim, in_features), jnp.float32, -bound_in, bound_in
    )
    bound_out = 1.0 / math.sqrt(inner_dim)
    w_out = jax.random.uniform(
        k_out, (out_features, inner_dim), jnp.float32, -bound_out, bound_out
    )
    bias = jax.random.uniform(
        k_b, (out_features,), jnp.float32, -bound_out, bound_out
    )
    return w_in, w_out, bias


if __name__ == "__main__":
    batch, seq = 2, 8
    in_features, out_features = 32, 16

    key = jax.random.PRNGKey(0)
    k_x, k_p = jax.random.split(key)
    x = jax.random.normal(k_x, (batch, seq, in_features), jnp.float32)
    w_in, w_out, bias = init_maestro_linear_params(k_p, in_features, out_features)

    out = maestro_linear(x, w_in, w_out, bias)
    out = jax.block_until_ready(out)

    # Reference check (plain JAX) for the fused two-matmul path.
    ref = (x @ w_in.T) @ w_out.T + bias
    assert out.shape == (batch, seq, out_features)
    assert jnp.allclose(out, ref, atol=2e-5, rtol=2e-5)

    print("KERNEL_OK")
</pallas_src>

<mosaic_0001>
module attributes {stable_mosaic.version = 11 : i64} {
  func.func @_maestro_linear_kernel(%arg0: i32, %arg1: i32, %arg2: memref<16x128xf32, #tpu.memory_space<vmem>>, %arg3: memref<128x128xf32, #tpu.memory_space<vmem>>, %arg4: memref<128x128xf32, #tpu.memory_space<vmem>>, %arg5: memref<1x128xf32, #tpu.memory_space<vmem>>, %arg6: memref<16x128xf32, #tpu.memory_space<vmem>>, %arg7: memref<16x128xf32, #tpu.memory_space<vmem>>) attributes {dimension_semantics = [#tpu.dimension_semantics<parallel>, #tpu.dimension_semantics<arbitrary>], iteration_bounds = array<i64: 1, 2>, scalar_prefetch = 0 : i64, scratch_operands = 1 : i64, tpu.core_type = #tpu.core_type<tc>, window_params = [{transform_indices = @transform_0, window_bounds = array<i64: 16, 128>}, {transform_indices = @transform_1, window_bounds = array<i64: 128, 128>}, {transform_indices = @transform_2, window_bounds = array<i64: 128, 128>}, {transform_indices = @transform_3, window_bounds = array<i64: 1, 128>}, {transform_indices = @transform_4, window_bounds = array<i64: 16, 128>}]} {
    %c0_i32 = arith.constant 0 : i32
    %0 = arith.cmpi eq, %arg1, %c0_i32 : i32
    %1 = arith.extui %0 : i1 to i32
    %c0_i32_0 = arith.constant 0 : i32
    %2 = arith.cmpi ne, %1, %c0_i32_0 : i32
    scf.if %2 {
      %cst = arith.constant 0.000000e+00 : f32
      %9 = vector.broadcast %cst : f32 to vector<16x128xf32>
      %c0 = arith.constant 0 : index
      %c0_4 = arith.constant 0 : index
      %10 = vector.load %arg7[%c0, %c0_4] : memref<16x128xf32, #tpu.memory_space<vmem>>, vector<16x128xf32>
      tpu.vector_store %arg7[%c0, %c0_4], %9 {strides = array<i32>} : memref<16x128xf32, #tpu.memory_space<vmem>>, vector<16x128xf32>,
    } else {
    }
    %c1_i32 = arith.constant 1 : i32
    %3 = arith.cmpi slt, %arg1, %c1_i32 : i32
    %4 = arith.extui %3 : i1 to i32
    %c0_i32_1 = arith.constant 0 : i32
    %5 = arith.cmpi ne, %4, %c0_i32_1 : i32
    scf.if %5 {
      %c0 = arith.constant 0 : index
      %c0_4 = arith.constant 0 : index
      %9 = vector.load %arg7[%c0, %c0_4] : memref<16x128xf32, #tpu.memory_space<vmem>>, vector<16x128xf32>
      %c0_5 = arith.constant 0 : index
      %c0_6 = arith.constant 0 : index
      %10 = vector.load %arg2[%c0_5, %c0_6] : memref<16x128xf32, #tpu.memory_space<vmem>>, vector<16x128xf32>
      %c0_7 = arith.constant 0 : index
      %c0_8 = arith.constant 0 : index
      %11 = vector.load %arg3[%c0_7, %c0_8] : memref<128x128xf32, #tpu.memory_space<vmem>>, vector<128x128xf32>
      %cst = arith.constant dense<0.000000e+00> : vector<16x128xf32>
      %12 = tpu.matmul %10, %11, %cst {dimension_numbers = #tpu.dot_dimension_numbers<[1], [0], [0], [1], [0, 0, 1, 1], [], []>} : vector<16x128xf32>, vector<128x128xf32>, vector<16x128xf32> -> vector<16x128xf32>
      %13 = arith.addf %9, %12 : vector<16x128xf32>
      %c0_9 = arith.constant 0 : index
      %c0_10 = arith.constant 0 : index
      %14 = vector.load %arg7[%c0_9, %c0_10] : memref<16x128xf32, #tpu.memory_space<vmem>>, vector<16x128xf32>
      tpu.vector_store %arg7[%c0_9, %c0_10], %13 {strides = array<i32>} : memref<16x128xf32, #tpu.memory_space<vmem>>, vector<16x128xf32>,
    } else {
    }
    %c1_i32_2 = arith.constant 1 : i32
    %6 = arith.cmpi sge, %arg1, %c1_i32_2 : i32
    %7 = arith.extui %6 : i1 to i32
    %c0_i32_3 = arith.constant 0 : i32
    %8 = arith.cmpi ne, %7, %c0_i32_3 : i32
    scf.if %8 {
      %c0 = arith.constant 0 : index
      %c0_4 = arith.constant 0 : index
      %9 = vector.load %arg7[%c0, %c0_4] : memref<16x128xf32, #tpu.memory_space<vmem>>, vector<16x128xf32>
      %c0_5 = arith.constant 0 : index
      %c0_6 = arith.constant 0 : index
      %10 = vector.load %arg4[%c0_5, %c0_6] : memref<128x128xf32, #tpu.memory_space<vmem>>, vector<128x128xf32>
      %cst = arith.constant dense<0.000000e+00> : vector<16x128xf32>
      %11 = tpu.matmul %9, %10, %cst {dimension_numbers = #tpu.dot_dimension_numbers<[1], [0], [0], [1], [0, 0, 1, 1], [], []>} : vector<16x128xf32>, vector<128x128xf32>, vector<16x128xf32> -> vector<16x128xf32>
      %c0_7 = arith.constant 0 : index
      %c0_8 = arith.constant 0 : index
      %12 = vector.load %arg5[%c0_7, %c0_8] : memref<1x128xf32, #tpu.memory_space<vmem>>, vector<1x128xf32>
      %13 = vector.broadcast %12 : vector<1x128xf32> to vector<16x128xf32>
      %14 = arith.addf %11, %13 : vector<16x128xf32>
      %c0_9 = arith.constant 0 : index
      %c0_10 = arith.constant 0 : index
      %15 = vector.load %arg6[%c0_9, %c0_10] : memref<16x128xf32, #tpu.memory_space<vmem>>, vector<16x128xf32>
      tpu.vector_store %arg6[%c0_9, %c0_10], %14 {strides = array<i32>} : memref<16x128xf32, #tpu.memory_space<vmem>>, vector<16x128xf32>,
    } else {
    }
    return
  }
  func.func @transform_0(%arg0: i32, %arg1: i32) -> (i32, i32) {
    %c0_i32 = arith.constant 0 : i32
    %0 = arith.minsi %arg1, %c0_i32 : i32
    %c0_i32_0 = arith.constant 0 : i32
    return %arg0, %0 : i32, i32
  }
  func.func @transform_1(%arg0: i32, %arg1: i32) -> (i32, i32) {
    %c0_i32 = arith.constant 0 : i32
    %0 = arith.minsi %arg1, %c0_i32 : i32
    %c0_i32_0 = arith.constant 0 : i32
    %c0_i32_1 = arith.constant 0 : i32
    return %0, %c0_i32_0 : i32, i32
  }
  func.func @transform_2(%arg0: i32, %arg1: i32) -> (i32, i32) {
    %c1_i32 = arith.constant 1 : i32
    %0 = arith.subi %arg1, %c1_i32 : i32
    %c0_i32 = arith.constant 0 : i32
    %1 = arith.maxsi %0, %c0_i32 : i32
    %c0_i32_0 = arith.constant 0 : i32
    %c0_i32_1 = arith.constant 0 : i32
    return %c0_i32_0, %1 : i32, i32
  }
  func.func @transform_3(%arg0: i32, %arg1: i32) -> (i32, i32) {
    %c1_i32 = arith.constant 1 : i32
    %0 = arith.subi %arg1, %c1_i32 : i32
    %c0_i32 = arith.constant 0 : i32
    %1 = arith.maxsi %0, %c0_i32 : i32
    %c0_i32_0 = arith.constant 0 : i32
    %c0_i32_1 = arith.constant 0 : i32
    return %c0_i32_0, %1 : i32, i32
  }
  func.func @transform_4(%arg0: i32, %arg1: i32) -> (i32, i32) {
    %c1_i32 = arith.constant 1 : i32
    %0 = arith.subi %arg1, %c1_i32 : i32
    %c0_i32 = arith.constant 0 : i32
    %1 = arith.maxsi %0, %c0_i32 : i32
    %c0_i32_0 = arith.constant 0 : i32
    return %arg0, %1 : i32, i32
  }
}

</mosaic_0001>

<bundles_post_ra>
// kernel: tpu_custom_call.1
= control target key start
LH: loop header
LB: loop body
LE: loop exit
PB: predicated region body
PF: predicated region fallthrough
CT: control target
= control target key end

     0   :  { %9 = vsyncpa [#allocation4], 0  ;;  %s1305_s0 = inlined_call_operand.hbm [shape: f32[16,128], index: 0, kind: input, shape index: {}]   ;;  %s1306_s1 = inlined_call_operand.hbm [shape: f32[128,128], index: 1, kind: input, shape index: {}]   ;;  %s1307_s2 = inlined_call_operand.hbm [shape: f32[128,128], index: 2, kind: input, shape index: {}]   ;;  %s1308_s3 = inlined_call_operand.vmem [shape: f32[1,128], index: 3, kind: input, shape index: {}]   ;;  %s1309_s4 = inlined_call_operand.hbm [shape: f32[16,128], index: 4, kind: output, shape index: {}]  }
   0x1   :  { %11 = vsyncpa [#allocation4 + $0x1], 0 }
   0x2   :  { %12 = vsyncpa [#allocation7], 0 }
   0x3   :  { %14 = vsyncpa [#allocation7 + $0x1], 0 }
   0x4   :  { %15 = vsyncpa [#allocation5], 0 }
   0x5   :  { %17 = vsyncpa [#allocation5 + $0x1], 0  ;;  %s1060_s15 = smov 0   ;;  %s1062_s16 = smov 0  }
   0x6   :  { %s1064_s17 = smov 0   ;;  %s1066_s18 = smov 0  }
   0x7   :  { %s1068_s19 = smov 0   ;;  %s1070_s20 = smov 0  }
   0x8   :  { %s1072_s21 = smov 0  }
   0x9 LB: > { %s1094_s22 = sadd.s32 4294967295, %s1025_s21   ;;  %s32_s23 = sadd.s32 1, %s1021_s20  ;;  %s1025_s21 = sphi %s1072_s21, %s23_s21   ;;  %s1021_s20 = sphi %s1070_s20, %s1320_s20   ;;  %s1017_s19 = sphi %s1068_s19, %s1319_s19   ;;  %s1013_s18 = sphi %s1066_s18, %s1295_s18   ;;  %s1009_s17 = sphi %s1064_s17, %s1318_s17   ;;  %s1005_s16 = sphi %s1062_s16, %s1290_s16   ;;  %s1001_s15 = sphi %s1060_s15, %s1317_s15  }
   0xa   : > { %p33_p0 = scmp.ge.s32.totalorder %s32_s23, 2  ;;  %p997_p1 = scmp.ne.s32.totalorder %s1013_s18, 0 }
   0xb   : > { %p56_p2 = scmp.eq.s32.totalorder %s1025_s21, 0  ;;  %p61_p3 = scmp.ne.s32.totalorder %s1013_s18, %s1009_s17 }
   0xc   : > { %s1322_s23 = smov (%p33_p0, %s32_s23), 0  ;;  %p62_p4 = scmp.eq.s32.totalorder %s1094_s22, 0 }
   0xd   : > { %p57_p5 = por %p997_p1, %p56_p2  ;;  %p747_p8 = scmp.lt.s32.totalorder %s1025_s21, 2 }
   0xe   : > { %p1107_p6 = por %p62_p4, %p61_p3  ;;  %s238_s26 = sand.u32 1, %s1025_s21  }
   0xf   : > { %p1115_p9 = pnand %p747_p8, %p57_p5  ;;  %s1027_s27 = smov [#allocation6]  }
  0x10   : > { %s252_s28 = sshll.u32 %s1027_s27, 4  ;;  %s250_s5 = sshll.u32 %s1306_s1, 4  ;;  %s253_s28 = int_to_ptr.vmem [resolvable:$true] %s252_s28  ;;  %s251_s5 = int_to_ptr.hbm [resolvable:$true] %s250_s5 }
  0x11   : > { %p673_p10 = scmp.ge.s32.totalorder %s1025_s21, 1  ;;  %s1124_s6 = scalar_lea.sflag [#allocation7], %s238_s26 }
  0x12   : > { %s827_s7 = sshra.s32 %s251_s5, 4  ;;  %p831_p12 = pneg %p1115_p9  ;;  %s828_s7 = int_to_ptr.hbm [resolvable:$true] %s827_s7 }
  0x13   : > { %s829_s8 = scalar_lea.hbm %s828_s7, 128  ;;  %s834_s11 = scalar_lea.hbm %s1306_s1, 128 }
  0x14   : > { %p830_p11 = scmp.ne.s32.totalorder %s828_s7, %s829_s8  ;;  %p836_p1 = scmp.lt.s32.totalorder %s834_s11, %s829_s8 }
  0x16   : > { %p832_p13 = pnand %p831_p12, %p830_p11 }
  0x18   : > { %p833_p0 = pneg %p832_p13 }
  0x1a   : > { %p838_p3 = pnand %p836_p1, %p833_p0 }
  0x1c   : > { %841 = shalt.err (!%p838_p3)
}
  0x1d   : > { %s1028_s12 = smov 128   ;;  %s1029_s13 = smov 8  }
  0x1e   : > { %739 = dma.hbm_to_vmem [thread:$0]  (!%p1115_p9), %s251_s5, 2048, %s253_s28, %s1124_s6, %s1028_s12, %s1028_s12, %s1029_s13  }
  0x1f   : > { %p296_p5 = scmp.lt.s32.totalorder %s1025_s21, 3  ;;  %s1030_s17 = smov [#allocation3]  }
  0x20   : > { %s228_s26 = sshll.u32 %s1030_s17, 4  ;;  %s226_s30 = sshll.u32 %s1305_s0, 4  ;;  %s229_s26 = int_to_ptr.vmem [resolvable:$true] %s228_s26  ;;  %s227_s30 = int_to_ptr.hbm [resolvable:$true] %s226_s30 }
  0x21   : > { %p1143_p11 = pnand %p673_p10, %p296_p5  ;;  %s857_s7 = sshra.s32 %s227_s30, 4  ;;  %s858_s7 = int_to_ptr.hbm [resolvable:$true] %s857_s7 }
  0x22   : > { %s859_s8 = scalar_lea.hbm %s858_s7, 16  ;;  %s864_s9 = scalar_lea.hbm %s1305_s0, 16 }
  0x23   : > { %p860_p13 = scmp.ne.s32.totalorder %s858_s7, %s859_s8  ;;  %p866_p10 = scmp.lt.s32.totalorder %s864_s9, %s859_s8 }
  0x25   : > { %p862_p0 = pnand %p860_p13, %p831_p12 }
  0x27   : > { %p863_p1 = pneg %p862_p0 }
  0x29   : > { %p868_p3 = pnand %p866_p10, %p863_p1 }
  0x2b   : > { %871 = shalt.err (!%p868_p3)
}
  0x2c   : > { %736 = dma.hbm_to_vmem [thread:$0]  (!%p1115_p9), %s227_s30, 256, %s229_s26, [#allocation4], %s1028_s12, %s1028_s12, %s1029_s13  }
  0x2d   : > { %s656_s10 = sadd.s32 4294967294, %s1025_s21   ;;  %p998_p12 = scmp.ne.s32.totalorder %s1005_s16, 0 }
  0x2e   : > { %p123_p13 = scmp.ne.s32.totalorder %s1005_s16, %s1001_s15  ;;  %p187_p0 = scmp.eq.s32.totalorder %s1094_s22, 1 }
  0x2f   : > { %p119_p5 = por %p998_p12, %p56_p2  ;;  %p193_p3 = scmp.eq.s32.totalorder %s656_s10, 1 }
  0x30   : > { %p1170_p1 = por %p123_p13, %p62_p4  ;;  %p1174_p10 = por %p998_p12, %p187_p0 }
  0x31   : > { %p1178_p7 = por %p193_p3, %p123_p13  ;;  %s274_s29 = sshll.u32 %s1307_s2, 4  ;;  %s275_s29 = int_to_ptr.hbm [resolvable:$true] %s274_s29 }
  0x32   : > { %s1031_s30 = smov [#allocation8]   ;;  %p740_p2 = pnand %p747_p8, %p119_p5 }
  0x33   : > { %s276_s7 = sshll.u32 %s1031_s30, 4  ;;  %s887_s8 = sshra.s32 %s275_s29, 4  ;;  %s277_s7 = int_to_ptr.vmem [resolvable:$true] %s276_s7  ;;  %s888_s8 = int_to_ptr.hbm [resolvable:$true] %s887_s8 }
  0x34   : > { %s889_s28 = scalar_lea.hbm %s888_s8, 128  ;;  %p891_p9 = pneg %p740_p2 }
  0x35   : > { %p890_p4 = scmp.ne.s32.totalorder %s888_s8, %s889_s28  ;;  %p895_p0 = scmp.lt.s32.totalorder %s888_s8, %s1307_s2 }
  0x37   : > { %p892_p12 = pnand %p891_p9, %p890_p4 }
  0x39   : > { %p893_p13 = pneg %p892_p12 }
  0x3b   : > { %p898_p3 = pnand %p895_p0, %p893_p13 }
  0x3d   : > { %901 = shalt.err (!%p898_p3)
}
  0x3e   : > { %742 = dma.hbm_to_vmem [thread:$0]  (!%p740_p2), %s275_s29, 2048, %s277_s7, %s1124_s6, %s1028_s12, %s1028_s12, %s1029_s13  }
  0x3f   : > { %300 = sbr.rel (%p1143_p11) target bundleno = 444 (0x1bc), region = 36  ;;  %s302_s10 = sand.u32 (!%p1143_p11), 1, %s1013_s18  }
  0x40   : > { %s674_s26 = sshll.u32 (!%p1143_p11), %s302_s10, 4  ;;  %s303_s27 = scalar_lea.sflag (!%p1143_p11), [#allocation4], %s302_s10 }
  0x41   : > { %s1197_s30 = scalar_lea.vmem (!%p1143_p11), [#allocation3], %s674_s26 }
  0x44   : > { %982 = dma.done.wait (%p1107_p6), %s303_s27, 256  }
  0x45   : > { %984 = vsyncadd (%p1107_p6), %s303_s27, 4294967040  ;;  %s312_s8 = sand.u32 1, %s1094_s22   ;;  %s675_s28 = sshll.u32 %s302_s10, 7 }
  0x46   : > { %s313_s6 = scalar_lea.sflag [#allocation7], %s312_s8  ;;  %s1204_s12 = scalar_lea.vmem [#allocation6], %s675_s28 }
  0x47   : > { %986 = dma.done.wait (%p1107_p6), %s313_s6, 2048  }
  0x48   : > { %988 = vsyncadd (%p1107_p6), %s313_s6, 4294965248  ;;  %s1211_s13 = sand.u32 1, %s1005_s16  }
  0x49   : > { %s676_s14 = sshll.u32 %s1211_s13, 7 }
  0x4a   : > { %s1214_s29 = scalar_lea.vmem [#allocation8], %s676_s14 }
  0x4b   : > { %990 = dma.done.wait (%p1170_p1), %s313_s6, 2048  }
  0x4c   : > { %992 = vsyncadd (%p1170_p1), %s313_s6, 4294965248  ;;  %s677_s22 = sshll.u32 %s1211_s13, 4  ;;  %p684_p8 = scmp.ne.s32.totalorder %s1017_s19, 0 }
  0x4d   : > { %s1221_s7 = scalar_lea.vmem [#allocation9], %s677_s22 }
  0x4e   : > { %393 = sbr.rel (%p684_p8) target bundleno = 86 (0x56), region = 52 }
  0x53   : > { %v1032_v0 = vmov 0.0  }
  0x54   : > { %394 = vst [vmem:[#allocation2] sm:$0xff] %v1032_v0 }
  0x55   : > { %395 = vst [vmem:[#allocation2 + $0x8] sm:$0xff] %v1032_v0 }
  0x56 PF: > { %p685_p6 = scmp.ge.s32.totalorder %s1017_s19, 1 }
  0x58   : > { %399 = sbr.rel (%p685_p6) target bundleno = 255 (0xff), region = 56 }
  0x5d   : > { %v419_v1 = vld [vmem:[%s1204_s12 + $0x78] sm:$0xff]  ;;  %v418_v2 = vld [vmem:[%s1204_s12 + $0x70] sm:$0xff]  ;;  %v417_v3 = vld [vmem:[%s1204_s12 + $0x68] sm:$0xff] }
  0x5e   : > { %420 = vmatpush.msra.mxu0 %v419_v1  ;;  %693 = vmatpush.msra.mxu1 %v419_v1  ;;  %v416_v4 = vld [vmem:[%s1204_s12 + $0x60] sm:$0xff]  ;;  %v415_v5 = vld [vmem:[%s1204_s12 + $0x58] sm:$0xff]  ;;  %v414_v6 = vld [vmem:[%s1204_s12 + $0x50] sm:$0xff] }
  0x5f   : > { %v413_v7 = vld [vmem:[%s1204_s12 + $0x48] sm:$0xff]  ;;  %v412_v8 = vld [vmem:[%s1204_s12 + $0x40] sm:$0xff]  ;;  %v411_v9 = vld [vmem:[%s1204_s12 + $0x38] sm:$0xff] }
  0x60   : > { %421 = vmatpush.msra.mxu0 %v418_v2  ;;  %694 = vmatpush.msra.mxu1 %v418_v2  ;;  %v410_v10 = vld [vmem:[%s1204_s12 + $0x30] sm:$0xff]  ;;  %v409_v11 = vld [vmem:[%s1204_s12 + $0x28] sm:$0xff]  ;;  %v408_v12 = vld [vmem:[%s1204_s12 + $0x20] sm:$0xff] }
  0x61   : > { %v407_v13 = vld [vmem:[%s1204_s12 + $0x18] sm:$0xff]  ;;  %v406_v14 = vld [vmem:[%s1204_s12 + $0x10] sm:$0xff]  ;;  %v405_v15 = vld [vmem:[%s1204_s12 + $0x8] sm:$0xff] }
  0x62   : > { %422 = vmatpush.msra.mxu0 %v417_v3  ;;  %695 = vmatpush.msra.mxu1 %v417_v3  ;;  %v404_v16 = vld [vmem:[%s1204_s12] sm:$0xff]  ;;  %v403_v18 = vld [vmem:[%s1197_s30 + $0x8] sm:$0xff]  ;;  %v400_v19 = vld [vmem:[#allocation2] sm:$0xff] }
  0x63   : > { %v402_v17 = vld [vmem:[%s1197_s30] sm:$0xff]  ;;  %v401_v20 = vld [vmem:[#allocation2 + $0x8] sm:$0xff] }
  0x64   : > { %423 = vmatpush.msra.mxu0 %v416_v4  ;;  %696 = vmatpush.msra.mxu1 %v416_v4 }
  0x66   : > { %424 = vmatpush.msra.mxu0 %v415_v5  ;;  %697 = vmatpush.msra.mxu1 %v415_v5 }
  0x68   : > { %425 = vmatpush.msra.mxu0 %v414_v6  ;;  %698 = vmatpush.msra.mxu1 %v414_v6 }
  0x6a   : > { %426 = vmatpush.msra.mxu0 %v413_v7  ;;  %699 = vmatpush.msra.mxu1 %v413_v7 }
  0x6c   : > { %427 = vmatpush.msra.mxu0 %v412_v8  ;;  %700 = vmatpush.msra.mxu1 %v412_v8 }
  0x6e   : > { %428 = vmatpush.msra.mxu0 %v411_v9  ;;  %701 = vmatpush.msra.mxu1 %v411_v9 }
  0x70   : > { %429 = vmatpush.msra.mxu0 %v410_v10  ;;  %702 = vmatpush.msra.mxu1 %v410_v10 }
  0x72   : > { %430 = vmatpush.msra.mxu0 %v409_v11  ;;  %703 = vmatpush.msra.mxu1 %v409_v11 }
  0x74   : > { %431 = vmatpush.msra.mxu0 %v408_v12  ;;  %704 = vmatpush.msra.mxu1 %v408_v12 }
  0x76   : > { %432 = vmatpush.msra.mxu0 %v407_v13  ;;  %705 = vmatpush.msra.mxu1 %v407_v13 }
  0x78   : > { %433 = vmatpush.msra.mxu0 %v406_v14  ;;  %706 = vmatpush.msra.mxu1 %v406_v14 }
  0x7a   : > { %434 = vmatpush.msra.mxu0 %v405_v15  ;;  %707 = vmatpush.msra.mxu1 %v405_v15 }
  0x7c   : > { %435 = vmatpush.msra.mxu0 %v404_v16  ;;  %708 = vmatpush.msra.mxu1 %v404_v16 }
  0x7d   : > { %436 = vmatmul.f32.vlgmr.msra.gmra.mxu0 %v402_v17  ;;  %439 = vmatmul.f32.vlgmr.msra.gmra.mxu1 %v403_v18 }
  0xfa   : > { %v437_v21 = vpop.f32.mrf.mxu0  ;;  %v440_v22 = vpop.f32.mrf.mxu1 }
  0xfb   : > { %v443_v23 = vadd.f32 %v437_v21, %v400_v19  ;;  %v444_v24 = vadd.f32 %v440_v22, %v401_v20 }
  0xfd   : > { %445 = vst [vmem:[#allocation2] sm:$0xff] %v443_v23 }
  0xfe   : > { %446 = vst [vmem:[#allocation2 + $0x8] sm:$0xff] %v444_v24 }
  0xff PF: > { %p686_p11 = scmp.lt.s32.totalorder %s1017_s19, 1 }
 0x101   : > { %450 = sbr.rel (%p686_p11) target bundleno = 424 (0x1a8), region = 60 }
 0x106   : > { %v468_v25 = vld [vmem:[%s1214_s29 + $0x78] sm:$0xff]  ;;  %v467_v26 = vld [vmem:[%s1214_s29 + $0x70] sm:$0xff]  ;;  %v466_v27 = vld [vmem:[%s1214_s29 + $0x68] sm:$0xff] }
 0x107   : > { %473 = vmatpush.msra.mxu0 %v468_v25  ;;  %709 = vmatpush.msra.mxu1 %v468_v25  ;;  %v465_v28 = vld [vmem:[%s1214_s29 + $0x60] sm:$0xff]  ;;  %v464_v29 = vld [vmem:[%s1214_s29 + $0x58] sm:$0xff]  ;;  %v463_v30 = vld [vmem:[%s1214_s29 + $0x50] sm:$0xff] }
 0x108   : > { %v462_v31 = vld [vmem:[%s1214_s29 + $0x48] sm:$0xff]  ;;  %v461_v32 = vld [vmem:[%s1214_s29 + $0x40] sm:$0xff]  ;;  %v460_v33 = vld [vmem:[%s1214_s29 + $0x38] sm:$0xff] }
 0x109   : > { %474 = vmatpush.msra.mxu0 %v467_v26  ;;  %710 = vmatpush.msra.mxu1 %v467_v26  ;;  %v459_v34 = vld [vmem:[%s1214_s29 + $0x30] sm:$0xff]  ;;  %v458_v35 = vld [vmem:[%s1214_s29 + $0x28] sm:$0xff]  ;;  %v457_v36 = vld [vmem:[%s1214_s29 + $0x20] sm:$0xff] }
 0x10a   : > { %v456_v37 = vld [vmem:[%s1214_s29 + $0x18] sm:$0xff]  ;;  %v455_v38 = vld [vmem:[%s1214_s29 + $0x10] sm:$0xff]  ;;  %v454_v39 = vld [vmem:[%s1214_s29 + $0x8] sm:$0xff] }
 0x10b   : > { %475 = vmatpush.msra.mxu0 %v466_v27  ;;  %711 = vmatpush.msra.mxu1 %v466_v27  ;;  %v453_v40 = vld [vmem:[%s1214_s29] sm:$0xff]  ;;  %v451_v41 = vld [vmem:[#allocation2] sm:$0xff]  ;;  %v452_v42 = vld [vmem:[#allocation2 + $0x8] sm:$0xff] }
 0x10c   : > { %v826_v43 = vld [vmem:[%s1308_s3] ss:$0 sm:$0xff] }
 0x10d   : > { %476 = vmatpush.msra.mxu0 %v465_v28  ;;  %712 = vmatpush.msra.mxu1 %v465_v28 }
 0x10f   : > { %477 = vmatpush.msra.mxu0 %v464_v29  ;;  %713 = vmatpush.msra.mxu1 %v464_v29 }
 0x111   : > { %478 = vmatpush.msra.mxu0 %v463_v30  ;;  %714 = vmatpush.msra.mxu1 %v463_v30 }
 0x113   : > { %479 = vmatpush.msra.mxu0 %v462_v31  ;;  %715 = vmatpush.msra.mxu1 %v462_v31 }
 0x115   : > { %480 = vmatpush.msra.mxu0 %v461_v32  ;;  %716 = vmatpush.msra.mxu1 %v461_v32 }
 0x117   : > { %481 = vmatpush.msra.mxu0 %v460_v33  ;;  %717 = vmatpush.msra.mxu1 %v460_v33 }
 0x119   : > { %482 = vmatpush.msra.mxu0 %v459_v34  ;;  %718 = vmatpush.msra.mxu1 %v459_v34 }
 0x11b   : > { %483 = vmatpush.msra.mxu0 %v458_v35  ;;  %719 = vmatpush.msra.mxu1 %v458_v35 }
 0x11d   : > { %484 = vmatpush.msra.mxu0 %v457_v36  ;;  %720 = vmatpush.msra.mxu1 %v457_v36 }
 0x11f   : > { %485 = vmatpush.msra.mxu0 %v456_v37  ;;  %721 = vmatpush.msra.mxu1 %v456_v37 }
 0x121   : > { %486 = vmatpush.msra.mxu0 %v455_v38  ;;  %722 = vmatpush.msra.mxu1 %v455_v38 }
 0x123   : > { %487 = vmatpush.msra.mxu0 %v454_v39  ;;  %723 = vmatpush.msra.mxu1 %v454_v39 }
 0x125   : > { %488 = vmatpush.msra.mxu0 %v453_v40  ;;  %724 = vmatpush.msra.mxu1 %v453_v40 }
 0x126   : > { %489 = vmatmul.f32.vlgmr.msra.gmra.mxu0 %v451_v41  ;;  %492 = vmatmul.f32.vlgmr.msra.gmra.mxu1 %v452_v42 }
 0x1a3   : > { %v490_v44 = vpop.f32.mrf.mxu0  ;;  %v493_v45 = vpop.f32.mrf.mxu1 }
 0x1a4   : > { %v491_v46 = vadd.f32 %v826_v43, %v490_v44  ;;  %v494_v47 = vadd.f32 %v826_v43, %v493_v45 }
 0x1a6   : > { %496 = vst [vmem:[%s1221_s7] sm:$0xff] %v491_v46 }
 0x1a7   : > { %497 = vst [vmem:[%s1221_s7 + $0x8] sm:$0xff] %v494_v47 }
 0x1a8 PF: > { %s688_s5 = sadd.s32 4294967295, %s1017_s19  ;;  %s515_s9 = sshll.u32 %s1221_s7, 4  ;;  %s516_s9 = int_to_ptr.vmem [resolvable:$true] %s515_s9 }
 0x1a9   : > { %p507_p5 = scmp.gt.s32.totalorder %s688_s5, 0  ;;  %s499_s28 = scalar_lea.sflag [#allocation5], %s1211_s13 }
 0x1aa   : > { %s937_s29 = scalar_lea.hbm %s1309_s4, 16 }
 0x1ab   : > { %s1324_s5 = smov (!%p507_p5, %s688_s5), 0 }
 0x1ac   : > { %s689_s10 = sshll.u32 %s1324_s5, 3 }
 0x1ad   : > { %s514_s30 = scalar_lea.hbm %s1309_s4, %s689_s10 }
 0x1ae   : > { %s517_s8 = sshll.u32 %s514_s30, 4  ;;  %s518_s8 = int_to_ptr.hbm [resolvable:$true] %s517_s8 }
 0x1af   : > { %s931_s6 = sshra.s32 %s518_s8, 4  ;;  %s932_s6 = int_to_ptr.hbm [resolvable:$true] %s931_s6 }
 0x1b0   : > { %s933_s12 = scalar_lea.hbm %s932_s6, 16  ;;  %p938_p9 = scmp.lt.s32.totalorder %s932_s6, %s1309_s4 }
 0x1b1   : > { %p934_p1 = scmp.ne.s32.totalorder %s932_s6, %s933_s12  ;;  %p939_p12 = scmp.lt.s32.totalorder %s937_s29, %s933_s12 }
 0x1b3   : > { %p935_p2 = pnand %p934_p1, %p1174_p10  ;;  %p940_p13 = por %p939_p12, %p938_p9 }
 0x1b5   : > { %p936_p4 = pneg %p935_p2 }
 0x1b7   : > { %p941_p0 = pnand %p940_p13, %p936_p4 }
 0x1b9   : > { %944 = shalt.err (!%p941_p0)
}
 0x1ba   : > { %s1033_s13 = smov 128   ;;  %s1034_s24 = smov 8  }
 0x1bb   : > { %731 = dma.vmem_to_hbm [thread:$0]  (%p1174_p10), %s516_s9, 256, %s518_s8, %s499_s28, %s1033_s13, %s1033_s13, %s1034_s24  }
 0x1bc PF: > { %s532_s25 = sand.u32 1, %s1001_s15   ;;  %p1316_p3 = scmp.ge.s32.totalorder %s1025_s21, 2 }
 0x1bd   : > { %s533_s5 = scalar_lea.sflag [#allocation5], %s532_s25 }
 0x1be   : > { %p744_p8 = pnand %p1316_p3, %p1178_p7 }
 0x1c0   : > { %p745_p6 = pneg %p744_p8 }
 0x1c2   : > { %994 = dma.done.wait (%p745_p6), %s533_s5, 256  }
 0x1c3   : > { %996 = vsyncadd (%p745_p6), %s533_s5, 4294967040  ;;  %s23_s21 = sadd.s32 1, %s1025_s21   ;;  %s1317_s15 = smov %s1005_s16 }
 0x1c4   : > { %p20_p11 = scmp.ge.s32.totalorder %s23_s21, 4   ;;  %s1290_s16 = smov 0  }
 0x1c5   : > { %s1318_s17 = smov %s1013_s18  ;;  %s1295_s18 = smov 0  }
 0x1c6   : > { %s1319_s19 = smov %s1021_s20  ;;  %s1320_s20 = smov %s1322_s23 }
 0x1c7   :  { %22 = sbr.rel (!%p20_p11) target bundleno = 9 (0x9), region = 120 }
 0x1cc   :  { %539 = vsyncpa [#allocation4], 1 }
 0x1cd   :  { %541 = vsyncpa [#allocation4 + $0x1], 1 }
 0x1ce   :  { %542 = vsyncpa [#allocation7], 1 }
 0x1cf   :  { %544 = vsyncpa [#allocation7 + $0x1], 1 }
 0x1d0   :  { %545 = vsyncpa [#allocation5], 1 }
 0x1d1   :  { %547 = vsyncpa [#allocation5 + $0x1], 1 }

</bundles_post_ra>
